<compile_context>
chip_gen: v7x
topology: tpu7x:2x2x1
jax: 0.10.0
libtpu: 0.0.40
codegen_flags: <defaults>
</compile_context>

<pallas_src>
import functools

import jax
import jax.numpy as jnp
import numpy as np
from jax.experimental import pallas as pl
from jax.experimental.pallas import tpu as pltpu


def _round_up(x, m):
    return (x + m - 1) // m * m


def _vmem_capacity_bytes():
    """Physical VMEM per TensorCore; conservative 64 MiB (v7x) fallback."""
    try:
        cap = int(pltpu.get_tpu_info().vmem_capacity_bytes)
        if cap > 0:
            return cap
    except Exception:
        pass
    return 64 * 1024 * 1024


# ---------------------------------------------------------------------------
# Kernel 1: partial convolution = im2col matmul (MXU) + mask-ratio scaling.
#   - mask count = XLU row-sum over the kk mask columns of the patches tile
#   - updated mask written to its own tiny (tm, 1) output
#   - optional fused BN statistics (per-tile partial sum / sumsq, f32)
#   - optional fused activation (only when BN is not used)
# ---------------------------------------------------------------------------
def _pconv_kernel(patches_ref, weight_ref, bias_ref, out_ref, umask_ref, *stats_refs,
                  slide_winsize, k_real, kk, act, has_bias, approx_recip, emit_stats):
    p = patches_ref[...]                                               # (tm, K_pad)
    acc = jnp.dot(p, weight_ref[...],
                  preferred_element_type=jnp.float32)                  # (tm, C_pad) f32

    # mask-window count: sum of the kk mask columns (exact even from bf16 {0,1})
    msum = jnp.sum(p[:, k_real:k_real + kk].astype(jnp.float32),
                   axis=1, keepdims=True)                              # (tm, 1)
    umask = jnp.clip(msum, 0.0, 1.0)
    if approx_recip:
        ratio = slide_winsize * pl.reciprocal(msum + 1e-8, approx=True) * umask
    else:
        ratio = (slide_winsize / (msum + 1e-8)) * umask

    out = acc * ratio                                                  # partial-conv rescale
    if has_bias:
        # PyTorch PartialConv2d: (raw_out - b)*ratio + b == conv*ratio + b, then *umask
        out = (out + bias_ref[...]) * umask

    if emit_stats:                                                     # fused BN stats (f32)
        psum_ref, psumsq_ref = stats_refs
        psum_ref[0] = jnp.sum(out, axis=0, keepdims=True)
        psumsq_ref[0] = jnp.sum(out * out, axis=0, keepdims=True)

    if act == "relu":
        out = jnp.maximum(out, 0.0)
    elif act == "leaky_relu":
        out = jnp.maximum(out, 0.2 * out)

    out_ref[...] = out.astype(out_ref.dtype)
    umask_ref[...] = umask.astype(umask_ref.dtype)


# ---------------------------------------------------------------------------
# Kernel 2: BatchNorm apply (prefolded per-channel scale/shift) + activation.
# Tiled over M, "parallel" (shards across TensorCores on v7x).
# ---------------------------------------------------------------------------
def _bn_act_kernel(x_ref, scale_ref, shift_ref, o_ref, *, act):
    y = x_ref[...].astype(jnp.float32) * scale_ref[...] + shift_ref[...]
    if act == "relu":
        y = jnp.maximum(y, 0.0)
    elif act == "leaky_relu":
        y = jnp.maximum(y, 0.2 * y)
    o_ref[...] = y.astype(o_ref.dtype)


# ---------------------------------------------------------------------------
# NHWC block (preferred entry point for chaining layers).
# ---------------------------------------------------------------------------
def pconv_block_nhwc(x_nhwc, m_nhwc, weight, *, bias=None, gamma=None, beta=None,
                     stride=1, padding=1, use_bn=True, activation="relu",
                     eps=1e-5, matmul_dtype=jnp.bfloat16, vmem_budget_bytes=None):
    """x_nhwc: (N, H, W, Cin) f32; m_nhwc: (N, H, W, 1) f32 of {0,1};
       weight: (Cout, Cin, kH, kW).  Returns (y_nhwc f32, updated_mask_nhwc f32)."""
    N, H, W, Cin = x_nhwc.shape
    Cout, Cin_w, kH, kW = weight.shape
    assert Cin_w == Cin
    OH = (H + 2 * padding - kH) // stride + 1
    OW = (W + 2 * padding - kW) // stride + 1
    KK = kH * kW
    K_real = Cin * KK
    slide_winsize = float(KK)          # non-multi-channel PartialConv2d mask updater

    # ---- XLA glue: pre-mask + im2col patch extraction (TODO: implicit GEMM) --
    xp = jnp.pad(x_nhwc * m_nhwc, ((0, 0), (padding, padding), (padding, padding), (0, 0)))
    mp = jnp.pad(m_nhwc, ((0, 0), (padding, padding), (padding, padding), (0, 0)))

    x_slices, m_slices = [], []
    for di in range(kH):
        for dj in range(kW):
            x_slices.append(xp[:, di:di + stride * OH:stride,
                               dj:dj + stride * OW:stride, :])         # (N, OH, OW, Cin)
            m_slices.append(mp[:, di:di + stride * OH:stride,
                               dj:dj + stride * OW:stride, 0])         # (N, OH, OW)

    M_real = N * OH * OW
    # Cin-major then (kh, kw) ordering matches torch weight.reshape(Cout, Cin*kH*kW)
    patches = jnp.stack(x_slices, axis=-1).reshape(M_real, K_real)
    mask_patches = jnp.stack(m_slices, axis=-1).reshape(M_real, KK)

    # ---- lane-dense padding ---------------------------------------------------
    K_aug = K_real + KK                       # conv columns + mask columns
    K_pad = _round_up(K_aug, 128)
    C_pad = _round_up(Cout, 128)              # NO extra mask column anymore

    in_bytes = jnp.dtype(matmul_dtype).itemsize
    if use_bn and jnp.dtype(matmul_dtype) != jnp.dtype(jnp.float32):
        interm_dtype = jnp.bfloat16           # bf16 intermediate slab (BN path)
    else:
        interm_dtype = jnp.float32            # f32 parity path / no-BN final output
    out1_bytes = jnp.dtype(interm_dtype).itemsize

    # ---- VMEM-budget-driven tile selection ------------------------------------
    vmem_cap = _vmem_capacity_bytes()
    budget = int(vmem_cap * 0.6) if vmem_budget_bytes is None else int(vmem_budget_bytes)

    def _est(t):
        # kernel 1: patches (2x), weight (assume 2x), output (2x), umask/stats/bias small
        e1 = (2 * t * K_pad * in_bytes + 2 * K_pad * C_pad * in_bytes
              + 2 * t * C_pad * out1_bytes + 2 * t * 512 + (1 << 20))
        # kernel 2 (BN apply): in (2x) + out f32 (2x)
        e2 = (2 * t * C_pad * out1_bytes + 2 * t * C_pad * 4 + (1 << 20)) if use_bn else 0
        return max(e1, e2)

    tm = 256
    while tm + 256 <= 4096 and _est(tm + 256) <= budget:
        tm += 256
    # keep the M grid >= 2 tiles where possible (v7x has 2 TensorCores)
    tm = min(tm, max(256, _round_up((M_real + 1) // 2, 256)))
    M_pad = _round_up(M_real, tm)
    n_tiles = M_pad // tm

    vmem_limit = int(min(vmem_cap - (4 << 20), max(_est(tm) + (8 << 20), 32 << 20)))
    cparams = pltpu.CompilerParams(dimension_semantics=("parallel",),
                                   vmem_limit_bytes=vmem_limit)

    # ---- operand packing -------------------------------------------------------
    patches_aug = jnp.concatenate([patches, mask_patches], axis=1)
    patches_aug = jnp.pad(patches_aug, ((0, M_pad - M_real), (0, K_pad - K_aug)))
    patches_aug = patches_aug.astype(matmul_dtype)

    w2d = weight.reshape(Cout, K_real).T.astype(jnp.float32)            # (K_real, Cout)
    w_aug = jnp.zeros((K_pad, C_pad), jnp.float32).at[:K_real, :Cout].set(w2d)
    w_aug = w_aug.astype(matmul_dtype)

    has_bias = bias is not None
    b_pad = jnp.zeros((1, C_pad), jnp.float32)
    if has_bias:
        b_pad = b_pad.at[0, :Cout].set(bias.astype(jnp.float32))

    # ---- Pallas kernel 1: partial conv + mask update (+ fused BN stats) --------
    emit_stats = use_bn
    out_shapes = [jax.ShapeDtypeStruct((M_pad, C_pad), interm_dtype),
                  jax.ShapeDtypeStruct((M_pad, 1), jnp.float32)]
    out_specs = [pl.BlockSpec((tm, C_pad), lambda i: (i, 0)),
                 pl.BlockSpec((tm, 1), lambda i: (i, 0))]
    if emit_stats:
        out_shapes.append(jax.ShapeDtypeStruct((n_tiles, 1, C_pad), jnp.float32))
        out_shapes.append(jax.ShapeDtypeStruct((n_tiles, 1, C_pad), jnp.float32))
        out_specs.append(pl.BlockSpec((1, 1, C_pad), lambda i: (i, 0, 0)))
        out_specs.append(pl.BlockSpec((1, 1, C_pad), lambda i: (i, 0, 0)))

    results = pl.pallas_call(
        functools.partial(_pconv_kernel,
                          slide_winsize=slide_winsize, k_real=K_real, kk=KK,
                          act=("none" if use_bn else activation),
                          has_bias=has_bias,
                          approx_recip=(jnp.dtype(matmul_dtype) != jnp.dtype(jnp.float32)),
                          emit_stats=emit_stats),
        out_shape=tuple(out_shapes),
        grid_spec=pltpu.PrefetchScalarGridSpec(
            num_scalar_prefetch=0,
            grid=(n_tiles,),
            in_specs=[pl.BlockSpec((tm, K_pad), lambda i: (i, 0)),
                      pl.BlockSpec((K_pad, C_pad), lambda i: (0, 0)),
                      pl.BlockSpec((1, C_pad), lambda i: (0, 0))],
            out_specs=tuple(out_specs)),
        compiler_params=cparams,
    )(patches_aug, w_aug, b_pad)

    if emit_stats:
        conv_out, umask_flat, psum, psumsq = results
    else:
        conv_out, umask_flat = results

    if use_bn:
        # Tiny XLA reduction of the per-tile partials (padded rows contribute 0,
        # so dividing by the REAL row count gives exact training-mode batch stats).
        csum = jnp.sum(psum, axis=(0, 1))                               # (C_pad,)
        csumsq = jnp.sum(psumsq, axis=(0, 1))
        mean = csum / float(M_real)
        var = jnp.maximum(csumsq / float(M_real) - mean * mean, 0.0)    # biased variance
        g = jnp.ones((Cout,), jnp.float32) if gamma is None else gamma.astype(jnp.float32)
        bt = jnp.zeros((Cout,), jnp.float32) if beta is None else beta.astype(jnp.float32)
        g_pad = jnp.zeros((C_pad,), jnp.float32).at[:Cout].set(g)
        bt_pad = jnp.zeros((C_pad,), jnp.float32).at[:Cout].set(bt)
        inv_std = jax.lax.rsqrt(var + eps)
        scale = (g_pad * inv_std).reshape(1, C_pad)
        shift = (bt_pad - mean * g_pad * inv_std).reshape(1, C_pad)

        # ---- Pallas kernel 2: BN apply (single FMA) + activation ---------------
        y_full = pl.pallas_call(
            functools.partial(_bn_act_kernel, act=activation),
            out_shape=jax.ShapeDtypeStruct((M_pad, C_pad), jnp.float32),
            grid_spec=pltpu.PrefetchScalarGridSpec(
                num_scalar_prefetch=0,
                grid=(n_tiles,),
                in_specs=[pl.BlockSpec((tm, C_pad), lambda i: (i, 0)),
                          pl.BlockSpec((1, C_pad), lambda i: (0, 0)),
                          pl.BlockSpec((1, C_pad), lambda i: (0, 0))],
                out_specs=pl.BlockSpec((tm, C_pad), lambda i: (i, 0))),
            compiler_params=cparams,
        )(conv_out, scale, shift)
    else:
        y_full = conv_out            # activation (if any) already fused in kernel 1

    y = y_full[:M_real, :Cout].reshape(N, OH, OW, Cout)
    umask = umask_flat[:M_real].reshape(N, OH, OW, 1)
    return y, umask


# ---------------------------------------------------------------------------
# NCHW wrapper (PyTorch-shape parity).  For multi-layer chaining prefer the
# NHWC entry point above and keep activations/masks in NHWC end-to-end.
# ---------------------------------------------------------------------------
def pconv_block(x, mask, weight, **kwargs):
    x_nhwc = jnp.transpose(x, (0, 2, 3, 1))
    m_nhwc = jnp.transpose(mask, (0, 2, 3, 1))
    y, um = pconv_block_nhwc(x_nhwc, m_nhwc, weight, **kwargs)
    return jnp.transpose(y, (0, 3, 1, 2)), jnp.transpose(um, (0, 3, 1, 2))


# ---------------------------------------------------------------------------
# Pure-JAX reference (NCHW) for correctness checks.
# ---------------------------------------------------------------------------
def _reference_block(x, mask, weight, *, bias=None, gamma=None, beta=None,
                     stride=1, padding=1, use_bn=True, activation="relu", eps=1e-5):
    Cout, Cin, kH, kW = weight.shape
    pads = [(padding, padding), (padding, padding)]
    raw = jax.lax.conv_general_dilated(x * mask, weight, (stride, stride), pads,
                                       dimension_numbers=("NCHW", "OIHW", "NCHW"))
    ones_w = jnp.ones((1, 1, kH, kW), jnp.float32)
    cnt = jax.lax.conv_general_dilated(mask, ones_w, (stride, stride), pads,
                                       dimension_numbers=("NCHW", "OIHW", "NCHW"))
    umask = jnp.clip(cnt, 0.0, 1.0)
    ratio = (float(kH * kW) / (cnt + 1e-8)) * umask
    out = raw * ratio
    if bias is not None:
        out = (out + bias.reshape(1, Cout, 1, 1)) * umask
    if use_bn:
        mean = out.mean(axis=(0, 2, 3), keepdims=True)
        var = out.var(axis=(0, 2, 3), keepdims=True)                    # biased
        g = jnp.ones((Cout,), jnp.float32) if gamma is None else gamma
        bt = jnp.zeros((Cout,), jnp.float32) if beta is None else beta
        out = ((out - mean) * jax.lax.rsqrt(var + eps) * g.reshape(1, Cout, 1, 1)
               + bt.reshape(1, Cout, 1, 1))
    if activation == "relu":
        out = jnp.maximum(out, 0.0)
    elif activation == "leaky_relu":
        out = jnp.where(out >= 0, out, 0.2 * out)
    return out, umask


if __name__ == "__main__":
    key = jax.random.PRNGKey(0)
    k1, k2, k3, k4, k5 = jax.random.split(key, 5)

    N, Cin, H, W = 2, 4, 16, 16
    Cout, kH, kW = 8, 3, 3

    x = jax.random.normal(k1, (N, Cin, H, W), jnp.float32)
    mask = (jax.random.uniform(k2, (N, 1, H, W)) > 0.3).astype(jnp.float32)
    weight = 0.1 * jax.random.normal(k3, (Cout, Cin, kH, kW), jnp.float32)
    gamma = 1.0 + 0.1 * jax.random.normal(k4, (Cout,), jnp.float32)
    beta = 0.05 * jnp.arange(Cout, dtype=jnp.float32)
    bias = 0.05 * jax.random.normal(k5, (Cout,), jnp.float32)

    # --- fast (bf16-fed) path: PBR / PBL / final-layer style -------------------
    y1, um1 = pconv_block(x, mask, weight, gamma=gamma, beta=beta,
                          stride=2, padding=1, use_bn=True, activation="relu")
    jax.block_until_ready((y1, um1))
    OH2 = (H + 2 - kH) // 2 + 1
    assert y1.shape == (N, Cout, OH2, OH2) and um1.shape == (N, 1, OH2, OH2)

    y2, um2 = pconv_block(x, mask, weight, gamma=gamma, beta=beta,
                          stride=1, padding=1, use_bn=True, activation="leaky_relu")
    jax.block_until_ready((y2, um2))
    assert y2.shape == (N, Cout, H, W) and um2.shape == (N, 1, H, W)

    y3, um3 = pconv_block(x, mask, weight, bias=bias,
                          stride=1, padding=1, use_bn=False, activation="none")
    jax.block_until_ready((y3, um3))
    assert y3.shape == (N, Cout, H, W)

    # --- numerical parity checks on the f32 path against a pure-JAX reference --
    configs = [
        dict(stride=2, use_bn=False, activation="relu", bias=None),        # PR
        dict(stride=2, use_bn=True, activation="relu", bias=None),         # PBR
        dict(stride=1, use_bn=True, activation="leaky_relu", bias=None),   # PBL
        dict(stride=1, use_bn=False, activation="none", bias=bias),        # final PartialConv2d
    ]
    for cfg in configs:
        got_y, got_m = pconv_block(x, mask, weight, bias=cfg["bias"], gamma=gamma,
                                   beta=beta, stride=cfg["stride"], padding=1,
                                   use_bn=cfg["use_bn"], activation=cfg["activation"],
                                   matmul_dtype=jnp.float32)
        ref_y, ref_m = _reference_block(x, mask, weight, bias=cfg["bias"], gamma=gamma,
                                        beta=beta, stride=cfg["stride"], padding=1,
                                        use_bn=cfg["use_bn"], activation=cfg["activation"])
        np.testing.assert_allclose(np.asarray(got_m), np.asarray(ref_m),
                                   atol=1e-5, rtol=1e-5)
        np.testing.assert_allclose(np.asarray(got_y), np.asarray(ref_y),
                                   atol=5e-2, rtol=5e-2)

    print("KERNEL_OK")
</pallas_src>

<mosaic_0001>
module attributes {stable_mosaic.version = 11 : i64} {
  func.func @_pconv_kernel(%arg0: i32, %arg1: memref<256x128xbf16, #tpu.memory_space<vmem>>, %arg2: memref<128x128xbf16, #tpu.memory_space<vmem>>, %arg3: memref<1x128xf32, #tpu.memory_space<vmem>>, %arg4: memref<256x128xbf16, #tpu.memory_space<vmem>>, %arg5: memref<256x1xf32, #tpu.memory_space<vmem>>, %arg6: memref<1x1x128xf32, #tpu.memory_space<vmem>>, %arg7: memref<1x1x128xf32, #tpu.memory_space<vmem>>) attributes {dimension_semantics = [#tpu.dimension_semantics<parallel>], iteration_bounds = array<i64: 1>, scalar_prefetch = 0 : i64, scratch_operands = 0 : i64, tpu.core_type = #tpu.core_type<tc>, window_params = [{transform_indices = @transform_0, window_bounds = array<i64: 256, 128>}, {pipeline_mode = #tpu.pipeline_mode<synchronous>, transform_indices = @transform_1, window_bounds = array<i64: 128, 128>}, {pipeline_mode = #tpu.pipeline_mode<synchronous>, transform_indices = @transform_2, window_bounds = array<i64: 1, 128>}, {transform_indices = @transform_3, window_bounds = array<i64: 256, 128>}, {transform_indices = @transform_4, window_bounds = array<i64: 256, 1>}, {transform_indices = @transform_5, window_bounds = array<i64: 1, 1, 128>}, {transform_indices = @transform_6, window_bounds = array<i64: 1, 1, 128>}]} {
    %c0 = arith.constant 0 : index
    %c0_0 = arith.constant 0 : index
    %0 = vector.load %arg1[%c0, %c0_0] : memref<256x128xbf16, #tpu.memory_space<vmem>>, vector<256x128xbf16>
    %c0_1 = arith.constant 0 : index
    %c0_2 = arith.constant 0 : index
    %1 = vector.load %arg2[%c0_1, %c0_2] : memref<128x128xbf16, #tpu.memory_space<vmem>>, vector<128x128xbf16>
    %cst = arith.constant dense<0.000000e+00> : vector<256x128xf32>
    %2 = tpu.matmul %0, %1, %cst {dimension_numbers = #tpu.dot_dimension_numbers<[1], [0], [0], [1], [0, 0, 1, 1], [], []>} : vector<256x128xbf16>, vector<128x128xbf16>, vector<256x128xf32> -> vector<256x128xf32>
    %3 = vector.extract_strided_slice %0 {offsets = [0, 36], sizes = [256, 9], strides = [1, 1]} : vector<256x128xbf16> to vector<256x9xbf16>
    %4 = arith.extf %3 : vector<256x9xbf16> to vector<256x9xf32>
    %cst_3 = arith.constant dense<0.000000e+00> : vector<256xf32>
    %5 = vector.multi_reduction <add>, %4, %cst_3 [1] : vector<256x9xf32> to vector<256xf32>
    %6 = vector.shape_cast %5 : vector<256xf32> to vector<256x1xf32>
    %cst_4 = arith.constant 0.000000e+00 : f32
    %cst_5 = arith.constant 1.000000e+00 : f32
    %7 = vector.broadcast %cst_4 : f32 to vector<256x1xf32>
    %8 = arith.maximumf %7, %6 : vector<256x1xf32>
    %9 = vector.broadcast %cst_5 : f32 to vector<256x1xf32>
    %10 = arith.minimumf %9, %8 : vector<256x1xf32>
    %cst_6 = arith.constant 9.99999993E-9 : f32
    %11 = vector.broadcast %cst_6 : f32 to vector<256x1xf32>
    %12 = arith.addf %6, %11 : vector<256x1xf32>
    %13 = tpu.reciprocal %12 {approx = true} : vector<256x1xf32> -> vector<256x1xf32>
    %cst_7 = arith.constant 9.000000e+00 : f32
    %14 = vector.broadcast %cst_7 : f32 to vector<256x1xf32>
    %15 = arith.mulf %14, %13 : vector<256x1xf32>
    %16 = arith.mulf %15, %10 : vector<256x1xf32>
    %17 = vector.broadcast %16 : vector<256x1xf32> to vector<256x128xf32>
    %18 = arith.mulf %2, %17 : vector<256x128xf32>
    %cst_8 = arith.constant dense<0.000000e+00> : vector<128xf32>
    %19 = vector.multi_reduction <add>, %18, %cst_8 [0] : vector<256x128xf32> to vector<128xf32>
    %20 = vector.shape_cast %19 : vector<128xf32> to vector<1x128xf32>
    %c0_9 = arith.constant 0 : index
    %c0_10 = arith.constant 0 : index
    %c0_11 = arith.constant 0 : index
    %21 = vector.load %arg6[%c0_9, %c0_10, %c0_11] : memref<1x1x128xf32, #tpu.memory_space<vmem>>, vector<1x1x128xf32>
    %22 = vector.shape_cast %21 : vector<1x1x128xf32> to vector<1x128xf32>
    %23 = vector.shape_cast %20 : vector<1x128xf32> to vector<1x1x128xf32>
    tpu.vector_store %arg6[%c0_9, %c0_10, %c0_11], %23 {strides = array<i32>} : memref<1x1x128xf32, #tpu.memory_space<vmem>>, vector<1x1x128xf32>,
    %24 = arith.mulf %18, %18 : vector<256x128xf32>
    %cst_12 = arith.constant dense<0.000000e+00> : vector<128xf32>
    %25 = vector.multi_reduction <add>, %24, %cst_12 [0] : vector<256x128xf32> to vector<128xf32>
    %26 = vector.shape_cast %25 : vector<128xf32> to vector<1x128xf32>
    %c0_13 = arith.constant 0 : index
    %c0_14 = arith.constant 0 : index
    %c0_15 = arith.constant 0 : index
    %27 = vector.load %arg7[%c0_13, %c0_14, %c0_15] : memref<1x1x128xf32, #tpu.memory_space<vmem>>, vector<1x1x128xf32>
    %28 = vector.shape_cast %27 : vector<1x1x128xf32> to vector<1x128xf32>
    %29 = vector.shape_cast %26 : vector<1x128xf32> to vector<1x1x128xf32>
    tpu.vector_store %arg7[%c0_13, %c0_14, %c0_15], %29 {strides = array<i32>} : memref<1x1x128xf32, #tpu.memory_space<vmem>>, vector<1x1x128xf32>,
    %30 = arith.truncf %18 : vector<256x128xf32> to vector<256x128xbf16>
    %c0_16 = arith.constant 0 : index
    %c0_17 = arith.constant 0 : index
    %31 = vector.load %arg4[%c0_16, %c0_17] : memref<256x128xbf16, #tpu.memory_space<vmem>>, vector<256x128xbf16>
    tpu.vector_store %arg4[%c0_16, %c0_17], %30 {strides = array<i32>} : memref<256x128xbf16, #tpu.memory_space<vmem>>, vector<256x128xbf16>,
    %c0_18 = arith.constant 0 : index
    %c0_19 = arith.constant 0 : index
    %32 = vector.load %arg5[%c0_18, %c0_19] : memref<256x1xf32, #tpu.memory_space<vmem>>, vector<256x1xf32>
    tpu.vector_store %arg5[%c0_18, %c0_19], %10 {strides = array<i32>} : memref<256x1xf32, #tpu.memory_space<vmem>>, vector<256x1xf32>,
    return
  }
  func.func @transform_0(%arg0: i32) -> (i32, i32) {
    %c0_i32 = arith.constant 0 : i32
    %c0_i32_0 = arith.constant 0 : i32
    return %arg0, %c0_i32 : i32, i32
  }
  func.func @transform_1(%arg0: i32) -> (i32, i32) {
    %c0_i32 = arith.constant 0 : i32
    %c0_i32_0 = arith.constant 0 : i32
    %c0_i32_1 = arith.constant 0 : i32
    return %c0_i32, %c0_i32_0 : i32, i32
  }
  func.func @transform_2(%arg0: i32) -> (i32, i32) {
    %c0_i32 = arith.constant 0 : i32
    %c0_i32_0 = arith.constant 0 : i32
    %c0_i32_1 = arith.constant 0 : i32
    return %c0_i32, %c0_i32_0 : i32, i32
  }
  func.func @transform_3(%arg0: i32) -> (i32, i32) {
    %c0_i32 = arith.constant 0 : i32
    %c0_i32_0 = arith.constant 0 : i32
    return %arg0, %c0_i32 : i32, i32
  }
  func.func @transform_4(%arg0: i32) -> (i32, i32) {
    %c0_i32 = arith.constant 0 : i32
    %c0_i32_0 = arith.constant 0 : i32
    return %arg0, %c0_i32 : i32, i32
  }
  func.func @transform_5(%arg0: i32) -> (i32, i32, i32) {
    %c0_i32 = arith.constant 0 : i32
    %c0_i32_0 = arith.constant 0 : i32
    %c0_i32_1 = arith.constant 0 : i32
    return %arg0, %c0_i32, %c0_i32_0 : i32, i32, i32
  }
  func.func @transform_6(%arg0: i32) -> (i32, i32, i32) {
    %c0_i32 = arith.constant 0 : i32
    %c0_i32_0 = arith.constant 0 : i32
    %c0_i32_1 = arith.constant 0 : i32
    return %arg0, %c0_i32, %c0_i32_0 : i32, i32, i32
  }
}

</mosaic_0001>

<bundles_post_ra>
// kernel: tpu_custom_call.1
= control target key start
LH: loop header
LB: loop body
LE: loop exit
PB: predicated region body
PF: predicated region fallthrough
CT: control target
= control target key end

     0   :  { %12 = vsyncpa [#allocation3], 0  ;;  %s2377_s0 = inlined_call_operand.hbm [shape: bf16[256,128], index: 0, kind: input, shape index: {}]   ;;  %s2378_s1 = inlined_call_operand.hbm [shape: bf16[128,128], index: 1, kind: input, shape index: {}]   ;;  %s2379_s2 = inlined_call_operand.vmem [shape: f32[1,128], index: 2, kind: input, shape index: {}]   ;;  %s2380_s3 = inlined_call_operand.hbm [shape: bf16[256,128], index: 3, kind: output, shape index: {0}]   ;;  %s2381_s4 = inlined_call_operand.vmem [shape: f32[256,1], index: 4, kind: output, shape index: {1}]   ;;  %s2382_s5 = inlined_call_operand.hbm [shape: f32[1,1,128], index: 5, kind: output, shape index: {2}]   ;;  %s2383_s6 = inlined_call_operand.hbm [shape: f32[1,1,128], index: 6, kind: output, shape index: {3}]  }
   0x1   :  { %13 = vsyncpa [#allocation6], 0 }
   0x2   :  { %14 = vsyncpa [#allocation4], 0 }
   0x3   :  { %15 = vsyncpa [#allocation9], 0  ;;  %s1814_s21 = smov [#allocation2]   ;;  %s1696_s24 = scalar_lea.hbm %s2377_s0, 2048 }
   0x4   :  { %s21_s22 = sshll.u32 %s1814_s21, 4  ;;  %p1697_p0 = scmp.ne.s32.totalorder %s2377_s0, %s1696_s24  ;;  %s22_s22 = int_to_ptr.vmem [resolvable:$true] %s21_s22 }
   0x5   :  { %p1700_p1 = scmp.lt.u32.totalorder %s1696_s24, %s2377_s0 }
   0x7   :  { %p1702_p2 = pnand %p1700_p1, %p1697_p0 }
   0x9   :  { %1705 = shalt.err (!%p1702_p2)
}
   0xa   :  { %s1706_s29 = scalar_lea.vmem %s22_s22, 2048  ;;  %p1711_p4 = scmp.lt.s32.totalorder %s22_s22, %s22_s22 }
   0xb   :  { %p1707_p3 = scmp.ne.s32.totalorder %s22_s22, %s1706_s29  ;;  %p1712_p5 = scmp.lt.s32.totalorder %s1706_s29, %s1706_s29 }
   0xd   :  { %p1713_p6 = por %p1712_p5, %p1711_p4 }
   0xf   :  { %p1714_p7 = pnand %p1713_p6, %p1707_p3 }
  0x11   :  { %1717 = shalt.err (!%p1714_p7)
}
  0x12   :  { %s1815_s30 = smov 64   ;;  %s1816_s7 = smov 4  }
  0x13   :  { %27 = dma.hbm_to_vmem [thread:$0]  %s2377_s0, 2048, %s22_s22, [#allocation3], %s1815_s30, %s1815_s30, %s1816_s7  }
  0x14   :  { %s1817_s10 = smov [#allocation5]   ;;  %s1718_s14 = scalar_lea.hbm %s2378_s1, 1024 }
  0x15   :  { %s33_s11 = sshll.u32 %s1817_s10, 4  ;;  %p1719_p8 = scmp.ne.s32.totalorder %s2378_s1, %s1718_s14  ;;  %s34_s11 = int_to_ptr.vmem [resolvable:$true] %s33_s11 }
  0x16   :  { %p1722_p9 = scmp.lt.u32.totalorder %s1718_s14, %s2378_s1 }
  0x18   :  { %p1724_p10 = pnand %p1722_p9, %p1719_p8 }
  0x1a   :  { %1727 = shalt.err (!%p1724_p10)
}
  0x1b   :  { %s1728_s19 = scalar_lea.vmem %s34_s11, 1024  ;;  %p1733_p12 = scmp.lt.s32.totalorder %s34_s11, %s34_s11 }
  0x1c   :  { %p1729_p11 = scmp.ne.s32.totalorder %s34_s11, %s1728_s19  ;;  %p1734_p13 = scmp.lt.s32.totalorder %s1728_s19, %s1728_s19 }
  0x1e   :  { %p1735_p0 = por %p1734_p13, %p1733_p12 }
  0x20   :  { %p1736_p1 = pnand %p1735_p0, %p1729_p11 }
  0x22   :  { %1739 = shalt.err (!%p1736_p1)
}
  0x23   :  { %39 = dma.hbm_to_vmem [thread:$0]  %s2378_s1, 1024, %s34_s11, [#allocation6], %s1815_s30, %s1815_s30, %s1816_s7  }
  0x24   :  { %1806 = dma.done.wait [#allocation3], 2048  }
  0x25   :  { %1807 = vsyncadd [#allocation3], 4294965248 }
  0x26   :  { %1808 = dma.done.wait [#allocation6], 1024  }
  0x27   :  { %1809 = vsyncadd [#allocation6], 4294966272  ;;  %v49_v0 = vld [vmem:[#allocation2] sm:$0xff]   ;;  %v1887_v1 = vld [vmem:[#allocation2 + $0x10] sm:$0xff]   ;;  %s1818_s1 = smov 92   ;;  %vm562_vm0 = vcmask 72704  }
  0x28   :  { %v1889_v2 = vld [vmem:[#allocation2 + $0x8] sm:$0xff]   ;;  %v402_v3 = vunpack.c.l.bf16 %v49_v0  ;;  %v403_v4 = vunpack.c.h.bf16 %v49_v0  ;;  %v406_v5 = vunpack.c.l.bf16 %v1887_v1  ;;  %v407_v6 = vunpack.c.h.bf16 %v1887_v1  ;;  %v1893_v7 = vld [vmem:[#allocation2 + $0x18] sm:$0xff]   ;;  %v1895_v8 = vld [vmem:[#allocation2 + $0x20] sm:$0xff]   ;;  %1456 = vmatprep.mubr.bf16.mxu0 %v49_v0 }
  0x29   :  { %v404_v9 = vunpack.c.l.bf16 %v1889_v2  ;;  %v405_v10 = vunpack.c.h.bf16 %v1889_v2  ;;  %v408_v11 = vunpack.c.l.bf16 %v1893_v7  ;;  %v409_v12 = vunpack.c.h.bf16 %v1893_v7  ;;  %v1901_v13 = vld [vmem:[#allocation2 + $0x28] sm:$0xff]   ;;  %v1592_v16 = vld [vmem:[#allocation5] sm:$0xff]   ;;  %v1909_v24 = vld [vmem:[#allocation2 + $0x30] sm:$0xff]  }
  0x2a   :  { %v1512_v14 = vpack.i.bf16 %v403_v4, %v402_v3  ;;  %v1522_v15 = vpack.i.bf16 %v407_v6, %v406_v5  ;;  %v410_v17 = vunpack.c.l.bf16 %v1895_v8  ;;  %v411_v18 = vunpack.c.h.bf16 %v1895_v8  ;;  %v1593_v19 = vld [vmem:[#allocation5 + $0x8] sm:$0xff]   ;;  %v1911_v25 = vld [vmem:[#allocation2 + $0x38] sm:$0xff]   ;;  %1440 = vmatprep.subr.bf16.mxu0 %v1592_v16  ;;  %1488 = vmatprep.subr.bf16.mxu1 %v1592_v16  ;;  %v1594_v29 = vld [vmem:[#allocation5 + $0x10] sm:$0xff]  }
  0x2b   :  { %v1517_v20 = vpack.i.bf16 %v405_v10, %v404_v9  ;;  %v1527_v21 = vpack.i.bf16 %v409_v12, %v408_v11  ;;  %v412_v22 = vunpack.c.l.bf16 %v1901_v13  ;;  %v413_v23 = vunpack.c.h.bf16 %v1901_v13  ;;  %1441 = vmatpush3.bf16.msra.mxu0 %v1592_v16  ;;  %1496 = vmatpush3.bf16.msra.mxu1 %v1592_v16  ;;  %v65_v33 = vld [vmem:[#allocation2 + $0x40] sm:$0xff]   ;;  %v1919_v34 = vld [vmem:[#allocation2 + $0x48] sm:$0xff]   ;;  %v1595_v37 = vld [vmem:[#allocation5 + $0x18] sm:$0xff]  }
  0x2c   :  { %1513 = vrot.lane.b32.xlu0 %v1512_v14, %s1818_s1  ;;  %1523 = vrot.lane.b32.xlu1 %v1522_v15, %s1818_s1  ;;  %v1532_v26 = vpack.i.bf16 %v411_v18, %v410_v17  ;;  %v414_v27 = vunpack.c.l.bf16 %v1909_v24  ;;  %v415_v28 = vunpack.c.h.bf16 %v1909_v24  ;;  %v416_v31 = vunpack.c.l.bf16 %v1911_v25  ;;  %v1925_v42 = vld [vmem:[#allocation2 + $0x50] sm:$0xff]   ;;  %v1927_v43 = vld [vmem:[#allocation2 + $0x58] sm:$0xff]   ;;  %v1596_v46 = vld [vmem:[#allocation5 + $0x20] sm:$0xff]  }
  0x2d   :  { %1442 = vmatprep.subr.bf16.mxu0 %v1593_v19  ;;  %1489 = vmatprep.subr.bf16.mxu1 %v1593_v19  ;;  %v1537_v30 = vpack.i.bf16 %v413_v23, %v412_v22  ;;  %v417_v32 = vunpack.c.h.bf16 %v1911_v25  ;;  %v418_v35 = vunpack.c.l.bf16 %v65_v33  ;;  %v419_v36 = vunpack.c.h.bf16 %v65_v33  ;;  %v73_v51 = vld [vmem:[#allocation2 + $0x60] sm:$0xff]   ;;  %v75_v52 = vld [vmem:[#allocation2 + $0x68] sm:$0xff]   ;;  %v77_v60 = vld [vmem:[#allocation2 + $0x70] sm:$0xff]  }
  0x2e   :  { %v1542_v38 = vpack.i.bf16 %v415_v28, %v414_v27  ;;  %v420_v40 = vunpack.c.l.bf16 %v1919_v34  ;;  %v421_v41 = vunpack.c.h.bf16 %v1919_v34  ;;  %v422_v45 = vunpack.c.l.bf16 %v1925_v42  ;;  %1472 = vmatprep.mubr.bf16.mxu1 %v65_v33  ;;  %v1597_v55 = vld [vmem:[#allocation5 + $0x28] sm:$0xff]   ;;  %v79_v61 = vld [vmem:[#allocation2 + $0x78] sm:$0xff]   ;;  %v1598_v63 = vld [vmem:[#allocation5 + $0x30] sm:$0xff]  }
  0x2f   :  { %1443 = vmatpush3.bf16.msra.mxu0 %v1593_v19  ;;  %1497 = vmatpush3.bf16.msra.mxu1 %v1593_v19  ;;  %v1547_v39 = vpack.i.bf16 %v417_v32, %v416_v31  ;;  %v1552_v44 = vpack.i.bf16 %v419_v36, %v418_v35  ;;  %v423_v48 = vunpack.c.h.bf16 %v1925_v42  ;;  %v424_v49 = vunpack.c.l.bf16 %v1927_v43  ;;  %v1599_v9 = vld [vmem:[#allocation5 + $0x38] sm:$0xff]  }
  0x30   :  { %1518 = vrot.lane.b32.xlu0 %v1517_v20, %s1818_s1  ;;  %1528 = vrot.lane.b32.xlu1 %v1527_v21, %s1818_s1  ;;  %v1557_v47 = vpack.i.bf16 %v421_v41, %v420_v40  ;;  %v425_v50 = vunpack.c.h.bf16 %v1927_v43  ;;  %v426_v53 = vunpack.c.l.bf16 %v73_v51  ;;  %v427_v54 = vunpack.c.h.bf16 %v73_v51 }
  0x31   :  { %1444 = vmatprep.subr.bf16.mxu0 %v1594_v29  ;;  %1490 = vmatprep.subr.bf16.mxu1 %v1594_v29  ;;  %v1562_v56 = vpack.i.bf16 %v423_v48, %v422_v45  ;;  %v428_v58 = vunpack.c.l.bf16 %v75_v52  ;;  %v429_v59 = vunpack.c.h.bf16 %v75_v52  ;;  %v430_v0 = vunpack.c.l.bf16 %v77_v60 }
  0x32   :  { %v1567_v57 = vpack.i.bf16 %v425_v50, %v424_v49  ;;  %v1572_v62 = vpack.i.bf16 %v427_v54, %v426_v53  ;;  %v431_v4 = vunpack.c.h.bf16 %v77_v60  ;;  %v432_v5 = vunpack.c.l.bf16 %v79_v61 }
  0x33   :  { %1445 = vmatpush3.bf16.msra.mxu0 %v1594_v29  ;;  %1498 = vmatpush3.bf16.msra.mxu1 %v1594_v29  ;;  %v1577_v3 = vpack.i.bf16 %v429_v59, %v428_v58  ;;  %v433_v6 = vunpack.c.h.bf16 %v79_v61  ;;  %vm1151_vm1 = vcmask 7168  }
  0x34   :  { %1533 = vrot.lane.b32.xlu0 %v1532_v26, %s1818_s1  ;;  %1538 = vrot.lane.b32.xlu1 %v1537_v30, %s1818_s1  ;;  %v1582_v10 = vpack.i.bf16 %v431_v4, %v430_v0 }
  0x35   :  { %1446 = vmatprep.subr.bf16.mxu0 %v1595_v37  ;;  %1491 = vmatprep.subr.bf16.mxu1 %v1595_v37  ;;  %v1587_v11 = vpack.i.bf16 %v433_v6, %v432_v5 }
  0x37   :  { %1447 = vmatpush3.bf16.msra.mxu0 %v1595_v37  ;;  %1499 = vmatpush3.bf16.msra.mxu1 %v1595_v37 }
  0x38   :  { %1543 = vrot.lane.b32.xlu0 %v1542_v38, %s1818_s1  ;;  %1548 = vrot.lane.b32.xlu1 %v1547_v39, %s1818_s1 }
  0x39   :  { %1448 = vmatprep.subr.bf16.mxu0 %v1596_v46  ;;  %1492 = vmatprep.subr.bf16.mxu1 %v1596_v46 }
  0x3b   :  { %1449 = vmatpush3.bf16.msra.mxu0 %v1596_v46  ;;  %1500 = vmatpush3.bf16.msra.mxu1 %v1596_v46 }
  0x3c   :  { %1553 = vrot.lane.b32.xlu0 %v1552_v44, %s1818_s1  ;;  %1558 = vrot.lane.b32.xlu1 %v1557_v47, %s1818_s1 }
  0x3d   :  { %1450 = vmatprep.subr.bf16.mxu0 %v1597_v55  ;;  %1493 = vmatprep.subr.bf16.mxu1 %v1597_v55 }
  0x3f   :  { %1451 = vmatpush3.bf16.msra.mxu0 %v1597_v55  ;;  %1501 = vmatpush3.bf16.msra.mxu1 %v1597_v55 }
  0x40   :  { %1563 = vrot.lane.b32.xlu0 %v1562_v56, %s1818_s1  ;;  %1568 = vrot.lane.b32.xlu1 %v1567_v57, %s1818_s1 }
  0x41   :  { %1452 = vmatprep.subr.bf16.mxu0 %v1598_v63  ;;  %1494 = vmatprep.subr.bf16.mxu1 %v1598_v63 }
  0x43   :  { %1453 = vmatpush3.bf16.msra.mxu0 %v1598_v63  ;;  %1502 = vmatpush3.bf16.msra.mxu1 %v1598_v63 }
  0x44   :  { %1573 = vrot.lane.b32.xlu0 %v1572_v62, %s1818_s1  ;;  %1578 = vrot.lane.b32.xlu1 %v1577_v3, %s1818_s1 }
  0x45   :  { %1454 = vmatprep.subr.bf16.mxu0 %v1599_v9  ;;  %1495 = vmatprep.subr.bf16.mxu1 %v1599_v9 }
  0x47   :  { %1455 = vmatpush3.bf16.msra.mxu0 %v1599_v9  ;;  %1503 = vmatpush3.bf16.msra.mxu1 %v1599_v9 }
  0x48   :  { %1583 = vrot.lane.b32.xlu0 %v1582_v10, %s1818_s1  ;;  %1588 = vrot.lane.b32.xlu1 %v1587_v11, %s1818_s1 }
  0x4a   :  { %1457 = vmatmul.mubr.bf16.vlgmr.msra.gmra.mrb[0].mxu0 %v1889_v2  ;;  %1473 = vmatmul.mubr.bf16.vlgmr.msra.gmra.mrb[0].mxu1 %v1919_v34 }
  0x4b   :  { %1460 = vmatprep.mubr.bf16.mxu0 %v1887_v1  ;;  %1476 = vmatprep.mubr.bf16.mxu1 %v1925_v42 }
  0x52   :  { %1461 = vmatmul.mubr.bf16.gmra.mrb[4].mxu0 %v1893_v7  ;;  %1477 = vmatmul.mubr.bf16.gmra.mrb[4].mxu1 %v1927_v43 }
  0x53   :  { %1464 = vmatprep.mubr.bf16.mxu0 %v1895_v8  ;;  %1480 = vmatprep.mubr.bf16.mxu1 %v73_v51 }
  0x5a   :  { %1465 = vmatmul.mubr.bf16.gmra.mrb[8].mxu0 %v1901_v13  ;;  %1481 = vmatmul.mubr.bf16.gmra.mrb[8].mxu1 %v75_v52 }
  0x5b   :  { %1468 = vmatprep.mubr.bf16.mxu0 %v1909_v24  ;;  %1484 = vmatprep.mubr.bf16.mxu1 %v77_v60 }
  0x62   :  { %1469 = vmatmul.mubr.bf16.gmra.mrb[12].mxu0 %v1911_v25  ;;  %1485 = vmatmul.mubr.bf16.gmra.mrb[12].mxu1 %v79_v61 }
  0x9e   :  { %v1514_v1 = vpop.permute.xlu0 %1513  ;;  %v1524_v2 = vpop.permute.xlu1 %1523 }
  0x9f   :  { %v1516_v12 = vunpack.i.h.bf16 %v1514_v1  ;;  %v1515_v14 = vunpack.i.l.bf16 %v1514_v1  ;;  %v1525_v7 = vunpack.i.l.bf16 %v1524_v2  ;;  %v1526_v26 = vunpack.i.h.bf16 %v1524_v2 }
  0xa1   :  { %v566_v8 = vsel %vm562_vm0, %v1516_v12, 0.0  ;;  %v563_v15 = vsel %vm562_vm0, %v1515_v14, 0.0  ;;  %v575_v19 = vsel %vm562_vm0, %v1525_v7, 0.0  ;;  %v578_v32 = vsel %vm562_vm0, %v1526_v26, 0.0 }
  0xa2   :  { %v1519_v16 = vpop.permute.xlu0 %1518  ;;  %567 = vadd.xlane.f32.xlu1 %v566_v8  ;;  %564 = vadd.xlane.f32.xlu0 %v563_v15  ;;  %v1529_v13 = vpop.permute.xlu1 %1528 }
  0xa3   :  { %v1520_v17 = vunpack.i.l.bf16 %v1519_v16  ;;  %v1530_v18 = vunpack.i.l.bf16 %v1529_v13  ;;  %v1521_v20 = vunpack.i.h.bf16 %v1519_v16  ;;  %v1531_v31 = vunpack.i.h.bf16 %v1529_v13 }
  0xa5   :  { %v569_v21 = vsel %vm562_vm0, %v1520_v17, 0.0  ;;  %v581_v24 = vsel %vm562_vm0, %v1530_v18, 0.0  ;;  %v572_v27 = vsel %vm562_vm0, %v1521_v20, 0.0  ;;  %v584_v37 = vsel %vm562_vm0, %v1531_v31, 0.0 }
  0xa6   :  { %576 = vadd.xlane.f32.xlu1 %v575_v19  ;;  %570 = vadd.xlane.f32.xlu0 %v569_v21  ;;  %v1534_v22 = vpop.permute.xlu0 %1533  ;;  %v1539_v25 = vpop.permute.xlu1 %1538 }
  0xa7   :  { %v1535_v23 = vunpack.i.l.bf16 %v1534_v22  ;;  %v1540_v28 = vunpack.i.l.bf16 %v1539_v25  ;;  %v1536_v36 = vunpack.i.h.bf16 %v1534_v22  ;;  %v1541_v41 = vunpack.i.h.bf16 %v1539_v25 }
  0xa9   :  { %v587_v29 = vsel %vm562_vm0, %v1535_v23, 0.0  ;;  %v593_v34 = vsel %vm562_vm0, %v1540_v28, 0.0  ;;  %v590_v42 = vsel %vm562_vm0, %v1536_v36, 0.0  ;;  %v596_v47 = vsel %vm562_vm0, %v1541_v41, 0.0 }
  0xaa   :  { %582 = vadd.xlane.f32.xlu1 %v581_v24  ;;  %573 = vadd.xlane.f32.xlu0 %v572_v27  ;;  %v1544_v30 = vpop.permute.xlu0 %1543  ;;  %v1549_v35 = vpop.permute.xlu1 %1548 }
  0xab   :  { %v1545_v33 = vunpack.i.l.bf16 %v1544_v30  ;;  %v1550_v38 = vunpack.i.l.bf16 %v1549_v35  ;;  %v1546_v46 = vunpack.i.h.bf16 %v1544_v30  ;;  %v1551_v51 = vunpack.i.h.bf16 %v1549_v35 }
  0xad   :  { %v599_v39 = vsel %vm562_vm0, %v1545_v33, 0.0  ;;  %v605_v44 = vsel %vm562_vm0, %v1550_v38, 0.0  ;;  %v602_v52 = vsel %vm562_vm0, %v1546_v46, 0.0  ;;  %v608_v57 = vsel %vm562_vm0, %v1551_v51, 0.0 }
  0xae   :  { %588 = vadd.xlane.f32.xlu1 %v587_v29  ;;  %579 = vadd.xlane.f32.xlu0 %v578_v32  ;;  %v1554_v40 = vpop.permute.xlu0 %1553  ;;  %v1559_v45 = vpop.permute.xlu1 %1558 }
  0xaf   :  { %v1555_v43 = vunpack.i.l.bf16 %v1554_v40  ;;  %v1560_v48 = vunpack.i.l.bf16 %v1559_v45  ;;  %v1556_v56 = vunpack.i.h.bf16 %v1554_v40  ;;  %v1561_v61 = vunpack.i.h.bf16 %v1559_v45 }
  0xb1   :  { %v611_v49 = vsel %vm562_vm0, %v1555_v43, 0.0  ;;  %v617_v54 = vsel %vm562_vm0, %v1560_v48, 0.0  ;;  %v614_v62 = vsel %vm562_vm0, %v1556_v56, 0.0  ;;  %v620_v5 = vsel %vm562_vm0, %v1561_v61, 0.0 }
  0xb2   :  { %594 = vadd.xlane.f32.xlu1 %v593_v34  ;;  %585 = vadd.xlane.f32.xlu0 %v584_v37  ;;  %v1564_v50 = vpop.permute.xlu0 %1563  ;;  %v1569_v55 = vpop.permute.xlu1 %1568 }
  0xb3   :  { %v1565_v53 = vunpack.i.l.bf16 %v1564_v50  ;;  %v1570_v58 = vunpack.i.l.bf16 %v1569_v55  ;;  %v1566_v4 = vunpack.i.h.bf16 %v1564_v50  ;;  %v1571_v11 = vunpack.i.h.bf16 %v1569_v55 }
  0xb5   :  { %v623_v59 = vsel %vm562_vm0, %v1565_v53, 0.0  ;;  %v629_v0 = vsel %vm562_vm0, %v1570_v58, 0.0  ;;  %v626_v1 = vsel %vm562_vm0, %v1566_v4, 0.0  ;;  %v632_v8 = vsel %vm562_vm0, %v1571_v11, 0.0 }
  0xb6   :  { %600 = vadd.xlane.f32.xlu1 %v599_v39  ;;  %591 = vadd.xlane.f32.xlu0 %v590_v42  ;;  %v1574_v60 = vpop.permute.xlu0 %1573  ;;  %v1579_v3 = vpop.permute.xlu1 %1578 }
  0xb7   :  { %v1575_v63 = vunpack.i.l.bf16 %v1574_v60  ;;  %v1580_v6 = vunpack.i.l.bf16 %v1579_v3  ;;  %v1576_v7 = vunpack.i.h.bf16 %v1574_v60  ;;  %v1581_v13 = vunpack.i.h.bf16 %v1579_v3 }
  0xb9   :  { %v635_v9 = vsel %vm562_vm0, %v1575_v63, 0.0  ;;  %v641_v12 = vsel %vm562_vm0, %v1580_v6, 0.0  ;;  %v638_v17 = vsel %vm562_vm0, %v1576_v7, 0.0  ;;  %v644_v20 = vsel %vm562_vm0, %v1581_v13, 0.0 }
  0xba   :  { %606 = vadd.xlane.f32.xlu1 %v605_v44  ;;  %597 = vadd.xlane.f32.xlu0 %v596_v47  ;;  %v1584_v10 = vpop.permute.xlu0 %1583  ;;  %v1589_v14 = vpop.permute.xlu1 %1588 }
  0xbb   :  { %v1585_v2 = vunpack.i.l.bf16 %v1584_v10  ;;  %v1590_v15 = vunpack.i.l.bf16 %v1589_v14  ;;  %v1586_v19 = vunpack.i.h.bf16 %v1584_v10  ;;  %v1591_v21 = vunpack.i.h.bf16 %v1589_v14 }
  0xbd   :  { %v647_v16 = vsel %vm562_vm0, %v1585_v2, 0.0  ;;  %v653_v18 = vsel %vm562_vm0, %v1590_v15, 0.0  ;;  %v650_v22 = vsel %vm562_vm0, %v1586_v19, 0.0  ;;  %v656_v23 = vsel %vm562_vm0, %v1591_v21, 0.0 }
  0xbe   :  { %612 = vadd.xlane.f32.xlu1 %v611_v49  ;;  %603 = vadd.xlane.f32.xlu0 %v602_v52 }
  0xc2   :  { %618 = vadd.xlane.f32.xlu1 %v617_v54  ;;  %609 = vadd.xlane.f32.xlu0 %v608_v57 }
  0xc6   :  { %624 = vadd.xlane.f32.xlu1 %v623_v59  ;;  %615 = vadd.xlane.f32.xlu0 %v614_v62 }
  0xca   :  { %630 = vadd.xlane.f32.xlu1 %v629_v0  ;;  %621 = vadd.xlane.f32.xlu0 %v620_v5 }
  0xce   :  { %636 = vadd.xlane.f32.xlu1 %v635_v9  ;;  %627 = vadd.xlane.f32.xlu0 %v626_v1 }
  0xd2   :  { %642 = vadd.xlane.f32.xlu1 %v641_v12  ;;  %633 = vadd.xlane.f32.xlu0 %v632_v8 }
  0xd6   :  { %648 = vadd.xlane.f32.xlu1 %v647_v16  ;;  %639 = vadd.xlane.f32.xlu0 %v638_v17 }
  0xda   :  { %654 = vadd.xlane.f32.xlu1 %v653_v18  ;;  %645 = vadd.xlane.f32.xlu0 %v644_v20 }
  0xde   :  { %651 = vadd.xlane.f32.xlu0 %v650_v22 }
  0xe2   :  { %657 = vadd.xlane.f32.xlu0 %v656_v23 }
 0x11d   :  { %v1985_v24 = vpop.f32.mrb[0].mxu0  ;;  %v1989_v26 = vpop.f32.mrb[0].mxu1 }
 0x11e   :  { %v1987_v25 = vpop.f32.mrb[1].mxu0  ;;  %v1993_v28 = vpop.f32.mrb[1].mxu1 }
 0x11f   :  { %v1991_v27 = vpop.f32.mrb[2].mxu0  ;;  %v1997_v30 = vpop.f32.mrb[2].mxu1 }
 0x120   :  { %v1995_v29 = vpop.f32.mrb[3].mxu0  ;;  %v1999_v31 = vpop.f32.mrb[3].mxu1 }
 0x125   :  { %v2001_v32 = vpop.f32.mrb[4].mxu0  ;;  %v2005_v34 = vpop.f32.mrb[4].mxu1 }
 0x126   :  { %v2003_v33 = vpop.f32.mrb[5].mxu0  ;;  %v2009_v36 = vpop.f32.mrb[5].mxu1 }
 0x127   :  { %v2007_v35 = vpop.f32.mrb[6].mxu0  ;;  %v2013_v38 = vpop.f32.mrb[6].mxu1 }
 0x128   :  { %v2011_v37 = vpop.f32.mrb[7].mxu0  ;;  %v2015_v39 = vpop.f32.mrb[7].mxu1 }
 0x12d   :  { %v2017_v46 = vpop.f32.mrb[8].mxu0  ;;  %v2019_v47 = vpop.f32.mrb[8].mxu1 }
 0x12e   :  { %v2021_v50 = vpop.f32.mrb[9].mxu0  ;;  %v2023_v51 = vpop.f32.mrb[9].mxu1 }
 0x12f   :  { %v568_v40 = vpop.xlane.xlu1 %567  ;;  %v565_v41 = vpop.xlane.xlu0 %564 }
 0x130   :  { %v660_v42 = vmax.f32 %v568_v40, 0.0  ;;  %v724_v43 = vadd.f32 1e-08, %v568_v40  ;;  %v659_v44 = vmax.f32 %v565_v41, 0.0  ;;  %v723_v45 = vadd.f32 1e-08, %v565_v41 }
 0x131   :  { %v2033_v58 = vpop.f32.mrb[10].mxu0  ;;  %v2035_v59 = vpop.f32.mrb[10].mxu1 }
 0x132   :  { %v692_v48 = vmin.f32 %v660_v42, 1.0  ;;  %1632 = vrcp.f32 %v724_v43  ;;  %v691_v49 = vmin.f32 %v659_v44, 1.0  ;;  %v2041_v62 = vpop.f32.mrb[11].mxu0  ;;  %v2043_v63 = vpop.f32.mrb[11].mxu1 }
 0x133   :  { %1634 = vrcp.f32 %v723_v45  ;;  %v577_v52 = vpop.xlane.xlu1 %576  ;;  %v571_v53 = vpop.xlane.xlu0 %570 }
 0x134   :  { %1153 = vst.msk [vmem:[%s2381_s4 + $0x8] sm:$0xff] %vm1151_vm1, %v692_v48  ;;  %1152 = vst.msk [vmem:[%s2381_s4] sm:$0xff] %vm1151_vm1, %v691_v49  ;;  %v663_v54 = vmax.f32 %v577_v52, 0.0  ;;  %v727_v55 = vadd.f32 1e-08, %v577_v52  ;;  %v661_v56 = vmax.f32 %v571_v53, 0.0 }
 0x135   :  { %v725_v57 = vadd.f32 1e-08, %v571_v53  ;;  %v2055_v10 = vpop.f32.mrb[12].mxu0  ;;  %v2057_v11 = vpop.f32.mrb[12].mxu1 }
 0x136   :  { %v2037_v60 = vmin.f32 %v663_v54, 1.0  ;;  %1636 = vrcp.f32 %v727_v55  ;;  %v2039_v61 = vmin.f32 %v661_v56, 1.0  ;;  %v2063_v12 = vpop.f32.mrb[13].mxu0  ;;  %v2065_v14 = vpop.f32.mrb[13].mxu1 }
 0x137   :  { %1638 = vrcp.f32 %v725_v57  ;;  %v583_v0 = vpop.xlane.xlu1 %582  ;;  %v574_v3 = vpop.xlane.xlu0 %573 }
 0x138   :  { %1156 = vst.msk [vmem:[%s2381_s4 + $0x20] sm:$0xff] %vm1151_vm1, %v2037_v60  ;;  %1154 = vst.msk [vmem:[%s2381_s4 + $0x10] sm:$0xff] %vm1151_vm1, %v2039_v61  ;;  %v665_v4 = vmax.f32 %v583_v0, 0.0  ;;  %v729_v5 = vadd.f32 1e-08, %v583_v0  ;;  %v662_v6 = vmax.f32 %v574_v3, 0.0 }
 0x139   :  { %v726_v9 = vadd.f32 1e-08, %v574_v3  ;;  %v2077_v21 = vpop.f32.mrb[14].mxu0  ;;  %v2079_v22 = vpop.f32.mrb[14].mxu1 }
 0x13a   :  { %v2059_v1 = vmin.f32 %v665_v4, 1.0  ;;  %1640 = vrcp.f32 %v729_v5  ;;  %v2061_v2 = vmin.f32 %v662_v6, 1.0  ;;  %v2085_v42 = vpop.f32.mrb[15].mxu0  ;;  %v2087_v43 = vpop.f32.mrb[15].mxu1 }
 0x13b   :  { %1642 = vrcp.f32 %v726_v9  ;;  %v589_v7 = vpop.xlane.xlu1 %588  ;;  %v580_v8 = vpop.xlane.xlu0 %579 }
 0x13c   :  { %v1633_v15 = vpop.eup %1632  ;;  %1158 = vst.msk [vmem:[%s2381_s4 + $0x30] sm:$0xff] %vm1151_vm1, %v2059_v1  ;;  %1155 = vst.msk [vmem:[%s2381_s4 + $0x18] sm:$0xff] %vm1151_vm1, %v2061_v2  ;;  %v667_v16 = vmax.f32 %v589_v7, 0.0  ;;  %v664_v13 = vmax.f32 %v580_v8, 0.0  ;;  %v728_v17 = vadd.f32 1e-08, %v580_v8 }
 0x13d   :  { %v1635_v18 = vpop.eup %1634  ;;  %v731_v19 = vadd.f32 1e-08, %v589_v7  ;;  %v788_v20 = vmul.f32 9.0, %v1633_v15 }
 0x13e   :  { %v2081_v23 = vmin.f32 %v667_v16, 1.0  ;;  %v2083_v40 = vmin.f32 %v664_v13, 1.0  ;;  %v787_v41 = vmul.f32 9.0, %v1635_v18  ;;  %1644 = vrcp.f32 %v728_v17 }
 0x13f   :  { %v595_v44 = vpop.xlane.xlu1 %594  ;;  %v586_v45 = vpop.xlane.xlu0 %585  ;;  %v820_v52 = vmul.f32 %v788_v20, %v692_v48  ;;  %1646 = vrcp.f32 %v731_v19 }
 0x140   :  { %v1637_v53 = vpop.eup %1636  ;;  %1160 = vst.msk [vmem:[%s2381_s4 + $0x40] sm:$0xff] %vm1151_vm1, %v2081_v23  ;;  %1157 = vst.msk [vmem:[%s2381_s4 + $0x28] sm:$0xff] %vm1151_vm1, %v2083_v40  ;;  %v819_v54 = vmul.f32 %v787_v41, %v691_v49  ;;  %v669_v55 = vmax.f32 %v595_v44, 0.0  ;;  %v733_v56 = vadd.f32 1e-08, %v595_v44  ;;  %v666_v57 = vmax.f32 %v586_v45, 0.0 }
 0x141   :  { %v1639_v0 = vpop.eup %1638  ;;  %v730_v48 = vadd.f32 1e-08, %v586_v45  ;;  %v852_v3 = vmul.f32 %v820_v52, %v1995_v29  ;;  %v791_v4 = vmul.f32 9.0, %v1637_v53 }
 0x142   :  { %v789_v5 = vmul.f32 9.0, %v1639_v0  ;;  %v851_v6 = vmul.f32 %v819_v54, %v1987_v25  ;;  %v2101_v9 = vmin.f32 %v669_v55, 1.0  ;;  %1648 = vrcp.f32 %v733_v56 }
 0x143   :  { %v2103_v7 = vmin.f32 %v666_v57, 1.0  ;;  %1650 = vrcp.f32 %v730_v48  ;;  %v922_v8 = vmul.f32 %v852_v3, %v852_v3  ;;  %v601_v49 = vpop.xlane.xlu1 %600  ;;  %v592_v15 = vpop.xlane.xlu0 %591  ;;  %v823_v16 = vmul.f32 %v791_v4, %v2037_v60 }
 0x144   :  { %v1641_v13 = vpop.eup %1640  ;;  %v821_v17 = vmul.f32 %v789_v5, %v2039_v61  ;;  %v921_v18 = vmul.f32 %v851_v6, %v851_v6  ;;  %1162 = vst.msk [vmem:[%s2381_s4 + $0x50] sm:$0xff] %vm1151_vm1, %v2101_v9  ;;  %v883_v25 = vadd.f32 %v852_v3, %v851_v6  ;;  %v1324_v29 = vpack.c.bf16 %v852_v3, %v851_v6 }
 0x145   :  { %v1643_v19 = vpop.eup %1642  ;;  %1159 = vst.msk [vmem:[%s2381_s4 + $0x38] sm:$0xff] %vm1151_vm1, %v2103_v7  ;;  %v671_v60 = vmax.f32 %v601_v49, 0.0  ;;  %v735_v20 = vadd.f32 1e-08, %v601_v49  ;;  %v668_v41 = vmax.f32 %v592_v15, 0.0  ;;  %v793_v53 = vmul.f32 9.0, %v1641_v13 }
 0x146   :  { %v732_v61 = vadd.f32 1e-08, %v592_v15  ;;  %v853_v44 = vmul.f32 %v1985_v24, %v821_v17  ;;  %v790_v45 = vmul.f32 9.0, %v1643_v19  ;;  %v953_v52 = vadd.f32 %v922_v8, %v921_v18  ;;  %1325 = vst [vmem:[#allocation7] sm:$0xff] %v1324_v29  }
 0x147   :  { %v2118_v54 = vmin.f32 %v671_v60, 1.0  ;;  %1652 = vrcp.f32 %v735_v20  ;;  %v2120_v55 = vmin.f32 %v668_v41, 1.0  ;;  %v607_v56 = vpop.xlane.xlu1 %606  ;;  %v598_v57 = vpop.xlane.xlu0 %597  ;;  %v855_v4 = vmul.f32 %v823_v16, %v2003_v33 }
 0x148   :  { %v923_v0 = vmul.f32 %v853_v44, %v853_v44  ;;  %v822_v48 = vmul.f32 %v790_v45, %v2061_v2  ;;  %v884_v3 = vadd.f32 %v883_v25, %v853_v44  ;;  %v1645_v5 = vpop.eup %1644  ;;  %1654 = vrcp.f32 %v732_v61 }
 0x149   :  { %1164 = vst.msk [vmem:[%s2381_s4 + $0x60] sm:$0xff] %vm1151_vm1, %v2118_v54  ;;  %1161 = vst.msk [vmem:[%s2381_s4 + $0x48] sm:$0xff] %vm1151_vm1, %v2120_v55  ;;  %v825_v24 = vmul.f32 %v793_v53, %v2059_v1  ;;  %v673_v2 = vmax.f32 %v607_v56, 0.0  ;;  %v737_v6 = vadd.f32 1e-08, %v607_v56  ;;  %v670_v49 = vmax.f32 %v598_v57, 0.0  ;;  %v1647_v16 = vpop.eup %1646 }
 0x14a   :  { %v854_v33 = vmul.f32 %v1991_v27, %v822_v48  ;;  %v954_v8 = vadd.f32 %v953_v52, %v923_v0  ;;  %v734_v15 = vadd.f32 1e-08, %v598_v57  ;;  %v792_v18 = vmul.f32 9.0, %v1645_v5 }
 0x14b   :  { %v857_v13 = vmul.f32 %v2001_v32, %v825_v24  ;;  %v2137_v17 = vmin.f32 %v673_v2, 1.0  ;;  %1656 = vrcp.f32 %v737_v6  ;;  %v613_v25 = vpop.xlane.xlu1 %612  ;;  %v604_v29 = vpop.xlane.xlu0 %603  ;;  %v2139_v41 = vmin.f32 %v670_v49, 1.0 }
 0x14c   :  { %v1649_v19 = vpop.eup %1648  ;;  %v924_v60 = vmul.f32 %v854_v33, %v854_v33  ;;  %v1329_v20 = vpack.c.bf16 %v854_v33, %v853_v44  ;;  %v885_v1 = vadd.f32 %v884_v3, %v854_v33  ;;  %v925_v27 = vmul.f32 %v855_v4, %v855_v4 }
 0x14d   :  { %v1651_v61 = vpop.eup %1650  ;;  %1166 = vst.msk [vmem:[%s2381_s4 + $0x70] sm:$0xff] %vm1151_vm1, %v2137_v17  ;;  %1658 = vrcp.f32 %v734_v15  ;;  %v824_v32 = vmul.f32 %v792_v18, %v2083_v40  ;;  %v675_v45 = vmax.f32 %v613_v25, 0.0  ;;  %1163 = vst.msk [vmem:[%s2381_s4 + $0x58] sm:$0xff] %vm1151_vm1, %v2139_v41  ;;  %v739_v56 = vadd.f32 1e-08, %v613_v25 }
 0x14e   :  { %1401 = vst [vmem:[#allocation7 + $0x8] sm:$0xff] %v1329_v20   ;;  %v886_v52 = vadd.f32 %v885_v1, %v855_v4  ;;  %v955_v53 = vadd.f32 %v954_v8, %v924_v60  ;;  %v794_v44 = vmul.f32 9.0, %v1651_v61  ;;  %v927_v57 = vmul.f32 %v857_v13, %v857_v13 }
 0x14f   :  { %v856_v0 = vmul.f32 %v824_v32, %v2011_v37  ;;  %v2153_v48 = vmin.f32 %v675_v45, 1.0  ;;  %v672_v3 = vmax.f32 %v604_v29, 0.0  ;;  %v619_v5 = vpop.xlane.xlu1 %618  ;;  %v610_v40 = vpop.xlane.xlu0 %609  ;;  %v736_v6 = vadd.f32 1e-08, %v604_v29 }
 0x150   :  { %v956_v24 = vadd.f32 %v955_v53, %v925_v27  ;;  %v826_v2 = vmul.f32 %v794_v44, %v2103_v7  ;;  %v797_v33 = vmul.f32 9.0, %v1649_v19  ;;  %1660 = vrcp.f32 %v739_v56 }
 0x151   :  { %v1653_v8 = vpop.eup %1652  ;;  %v887_v49 = vadd.f32 %v886_v52, %v856_v0  ;;  %v926_v15 = vmul.f32 %v856_v0, %v856_v0  ;;  %v1334_v18 = vpack.c.bf16 %v856_v0, %v855_v4  ;;  %1168 = vst.msk [vmem:[%s2381_s4 + $0x80] sm:$0xff] %vm1151_vm1, %v2153_v48  ;;  %v2161_v37 = vmin.f32 %v672_v3, 1.0 }
 0x152   :  { %v858_v25 = vmul.f32 %v2007_v35, %v826_v2  ;;  %v829_v60 = vmul.f32 %v797_v33, %v2101_v9  ;;  %v795_v7 = vmul.f32 9.0, %v1647_v16  ;;  %v1655_v29 = vpop.eup %1654  ;;  %v677_v4 = vmax.f32 %v619_v5, 0.0 }
 0x153   :  { %v888_v19 = vadd.f32 %v887_v49, %v857_v13  ;;  %v957_v20 = vadd.f32 %v956_v24, %v926_v15  ;;  %1402 = vst [vmem:[#allocation7 + $0x10] sm:$0xff] %v1334_v18   ;;  %1165 = vst.msk [vmem:[%s2381_s4 + $0x68] sm:$0xff] %vm1151_vm1, %v2161_v37  ;;  %v741_v1 = vadd.f32 1e-08, %v619_v5  ;;  %v625_v61 = vpop.xlane.xlu1 %624  ;;  %v616_v27 = vpop.xlane.xlu0 %615  ;;  %1662 = vrcp.f32 %v736_v6 }
 0x154   :  { %v928_v32 = vmul.f32 %v858_v25, %v858_v25  ;;  %v1339_v35 = vpack.c.bf16 %v858_v25, %v857_v13  ;;  %v827_v9 = vmul.f32 %v795_v7, %v2081_v23  ;;  %v2171_v53 = vmin.f32 %v677_v4, 1.0 }
 0x155   :  { %v1657_v16 = vpop.eup %1656  ;;  %v958_v45 = vadd.f32 %v957_v20, %v927_v57  ;;  %v889_v52 = vadd.f32 %v888_v19, %v858_v25  ;;  %1664 = vrcp.f32 %v741_v1  ;;  %v861_v44 = vmul.f32 %v2017_v46, %v829_v60 }
 0x156   :  { %1403 = vst [vmem:[#allocation7 + $0x18] sm:$0xff] %v1339_v35   ;;  %v859_v56 = vmul.f32 %v827_v9, %v2021_v50  ;;  %v674_v0 = vmax.f32 %v610_v40, 0.0  ;;  %v738_v3 = vadd.f32 1e-08, %v610_v40  ;;  %1170 = vst.msk [vmem:[%s2381_s4 + $0x90] sm:$0xff] %vm1151_vm1, %v2171_v53  ;;  %v796_v23 = vmul.f32 9.0, %v1655_v29 }
 0x157   :  { %v1659_v5 = vpop.eup %1658  ;;  %v959_v24 = vadd.f32 %v958_v45, %v928_v32  ;;  %v679_v13 = vmax.f32 %v625_v61, 0.0  ;;  %v743_v57 = vadd.f32 1e-08, %v625_v61  ;;  %v622_v2 = vpop.xlane.xlu0 %621  ;;  %v676_v25 = vmax.f32 %v616_v27, 0.0 }
 0x158   :  { %v890_v6 = vadd.f32 %v889_v52, %v859_v56  ;;  %v929_v33 = vmul.f32 %v859_v56, %v859_v56  ;;  %v2180_v49 = vmin.f32 %v674_v0, 1.0  ;;  %1666 = vrcp.f32 %v738_v3  ;;  %v631_v15 = vpop.xlane.xlu1 %630 }
 0x159   :  { %v798_v46 = vmul.f32 9.0, %v1659_v5  ;;  %v828_v50 = vmul.f32 %v796_v23, %v2120_v55  ;;  %v2183_v40 = vmin.f32 %v679_v13, 1.0  ;;  %1668 = vrcp.f32 %v743_v57 }
 0x15a   :  { %v960_v18 = vadd.f32 %v959_v24, %v929_v33  ;;  %1167 = vst.msk [vmem:[%s2381_s4 + $0x78] sm:$0xff] %vm1151_vm1, %v2180_v49  ;;  %v740_v60 = vadd.f32 1e-08, %v616_v27  ;;  %v801_v7 = vmul.f32 9.0, %v1657_v16  ;;  %v799_v55 = vmul.f32 9.0, %v1653_v8  ;;  %v1661_v1 = vpop.eup %1660 }
 0x15b   :  { %v830_v29 = vmul.f32 %v798_v46, %v2139_v41  ;;  %v860_v19 = vmul.f32 %v828_v50, %v2041_v62  ;;  %1172 = vst.msk [vmem:[%s2381_s4 + $0xa0] sm:$0xff] %vm1151_vm1, %v2183_v40  ;;  %v681_v20 = vmax.f32 %v631_v15, 0.0  ;;  %v628_v4 = vpop.xlane.xlu0 %627  ;;  %v2197_v61 = vmin.f32 %v676_v25, 1.0 }
 0x15c   :  { %1670 = vrcp.f32 %v740_v60  ;;  %v833_v27 = vmul.f32 %v801_v7, %v2137_v17  ;;  %v745_v32 = vadd.f32 1e-08, %v631_v15  ;;  %v931_v45 = vmul.f32 %v861_v44, %v861_v44 }
 0x15d   :  { %v862_v41 = vmul.f32 %v2033_v58, %v830_v29  ;;  %v891_v35 = vadd.f32 %v890_v6, %v860_v19  ;;  %v930_v62 = vmul.f32 %v860_v19, %v860_v19  ;;  %v1344_v9 = vpack.c.bf16 %v860_v19, %v859_v56  ;;  %v1663_v16 = vpop.eup %1662  ;;  %1169 = vst.msk [vmem:[%s2381_s4 + $0x88] sm:$0xff] %vm1151_vm1, %v2197_v61  ;;  %v637_v56 = vpop.xlane.xlu1 %636 }
 0x15e   :  { %v831_v8 = vmul.f32 %v799_v55, %v2118_v54  ;;  %v2207_v52 = vmin.f32 %v681_v20, 1.0  ;;  %1672 = vrcp.f32 %v745_v32  ;;  %v865_v23 = vmul.f32 %v2055_v10, %v833_v27 }
 0x15f   :  { %v1665_v17 = vpop.eup %1664  ;;  %v932_v0 = vmul.f32 %v862_v41, %v862_v41  ;;  %v1349_v3 = vpack.c.bf16 %v862_v41, %v861_v44  ;;  %v892_v58 = vadd.f32 %v891_v35, %v861_v44  ;;  %v961_v5 = vadd.f32 %v960_v18, %v930_v62  ;;  %1404 = vst [vmem:[#allocation7 + $0x20] sm:$0xff] %v1344_v9   ;;  %v2209_v24 = vpop.xlane.xlu0 %633 }
 0x160   :  { %v863_v13 = vmul.f32 %v831_v8, %v2063_v12  ;;  %1174 = vst.msk [vmem:[%s2381_s4 + $0xb0] sm:$0xff] %vm1151_vm1, %v2207_v52  ;;  %v678_v54 = vmax.f32 %v622_v2, 0.0  ;;  %v742_v57 = vadd.f32 1e-08, %v622_v2  ;;  %v800_v33 = vmul.f32 9.0, %v1663_v16 }
 0x161   :  { %1405 = vst [vmem:[#allocation7 + $0x28] sm:$0xff] %v1349_v3   ;;  %v962_v6 = vadd.f32 %v961_v5, %v931_v45  ;;  %v893_v44 = vadd.f32 %v892_v58, %v862_v41  ;;  %v805_v46 = vmul.f32 9.0, %v1665_v17  ;;  %v683_v10 = vmax.f32 %v637_v56, 0.0  ;;  %v643_v62 = vpop.xlane.xlu1 %642 }
 0x162   :  { %v1667_v50 = vpop.eup %1666  ;;  %v933_v15 = vmul.f32 %v863_v13, %v863_v13  ;;  %v2218_v18 = vmin.f32 %v678_v54, 1.0  ;;  %1674 = vrcp.f32 %v742_v57  ;;  %v832_v29 = vmul.f32 %v800_v33, %v2161_v37 }
 0x163   :  { %v2220_v12 = vpop.eup %1668  ;;  %v894_v25 = vadd.f32 %v893_v44, %v863_v13  ;;  %v963_v60 = vadd.f32 %v962_v6, %v932_v0  ;;  %v802_v7 = vmul.f32 9.0, %v1667_v50  ;;  %v837_v2 = vmul.f32 %v805_v46, %v2171_v53  ;;  %v640_v37 = vpop.xlane.xlu0 %639 }
 0x164   :  { %1171 = vst.msk [vmem:[%s2381_s4 + $0x98] sm:$0xff] %vm1151_vm1, %v2218_v18  ;;  %v2229_v19 = vmin.f32 %v683_v10, 1.0  ;;  %v747_v55 = vadd.f32 1e-08, %v637_v56  ;;  %v680_v20 = vmax.f32 %v628_v4, 0.0  ;;  %v864_v41 = vmul.f32 %v832_v29, %v2085_v42 }
 0x165   :  { %v964_v27 = vadd.f32 %v963_v60, %v933_v15  ;;  %v834_v32 = vmul.f32 %v802_v7, %v2180_v49  ;;  %v744_v35 = vadd.f32 1e-08, %v628_v4  ;;  %v935_v16 = vmul.f32 %v865_v23, %v865_v23 }
 0x166   :  { %v1671_v9 = vpop.eup %1670  ;;  %1676 = vrcp.f32 %v747_v55  ;;  %1176 = vst.msk [vmem:[%s2381_s4 + $0xc0] sm:$0xff] %vm1151_vm1, %v2229_v19  ;;  %v2238_v53 = vmin.f32 %v680_v20, 1.0  ;;  %v803_v45 = vmul.f32 9.0, %v1661_v1  ;;  %v895_v49 = vadd.f32 %v894_v25, %v864_v41 }
 0x167   :  { %v866_v8 = vmul.f32 %v2077_v21, %v834_v32  ;;  %v934_v17 = vmul.f32 %v864_v41, %v864_v41  ;;  %v1354_v42 = vpack.c.bf16 %v864_v41, %v863_v13  ;;  %v2242_v0 = vmul.f32 %v1989_v26, %v837_v2  ;;  %v646_v50 = vpop.xlane.xlu0 %645 }
 0x168   :  { %v1673_v4 = vpop.eup %1672  ;;  %1678 = vrcp.f32 %v744_v35  ;;  %1173 = vst.msk [vmem:[%s2381_s4 + $0xa8] sm:$0xff] %vm1151_vm1, %v2238_v53  ;;  %v835_v3 = vmul.f32 %v803_v45, %v2153_v48  ;;  %v685_v58 = vmax.f32 %v643_v62, 0.0  ;;  %v896_v21 = vadd.f32 %v895_v49, %v865_v23  ;;  %v649_v48 = vpop.xlane.xlu1 %648 }
 0x169   :  { %v936_v1 = vmul.f32 %v866_v8, %v866_v8  ;;  %v1359_v5 = vpack.c.bf16 %v866_v8, %v865_v23  ;;  %v965_v56 = vadd.f32 %v964_v27, %v934_v17  ;;  %1406 = vst [vmem:[#allocation7 + $0x30] sm:$0xff] %v1354_v42   ;;  %v749_v26 = vadd.f32 1e-08, %v643_v62 }
 0x16a   :  { %v867_v13 = vmul.f32 %v835_v3, %v1993_v28  ;;  %v2251_v54 = vmin.f32 %v685_v58, 1.0  ;;  %v682_v57 = vmax.f32 %v2209_v24, 0.0  ;;  %v897_v44 = vadd.f32 %v896_v21, %v866_v8 }
 0x16b   :  { %1407 = vst [vmem:[#allocation7 + $0x38] sm:$0xff] %v1359_v5   ;;  %v966_v6 = vadd.f32 %v965_v56, %v935_v16  ;;  %v746_v33 = vadd.f32 1e-08, %v2209_v24  ;;  %v804_v46 = vmul.f32 9.0, %v1671_v9  ;;  %1680 = vrcp.f32 %v749_v26  ;;  %v652_v49 = vpop.xlane.xlu0 %651 }
 0x16c   :  { %v1675_v15 = vpop.eup %1674  ;;  %v937_v10 = vmul.f32 %v867_v13, %v867_v13  ;;  %1178 = vst.msk [vmem:[%s2381_s4 + $0xd0] sm:$0xff] %vm1151_vm1, %v2251_v54  ;;  %v2260_v28 = vmin.f32 %v682_v57, 1.0  ;;  %v809_v23 = vmul.f32 9.0, %v1673_v4  ;;  %v898_v25 = vadd.f32 %v897_v44, %v867_v13 }
 0x16d   :  { %v967_v60 = vadd.f32 %v966_v6, %v936_v1  ;;  %1682 = vrcp.f32 %v746_v33  ;;  %v806_v7 = vmul.f32 9.0, %v1675_v15  ;;  %v836_v24 = vmul.f32 %v804_v46, %v2197_v61 }
 0x16e   :  { %1175 = vst.msk [vmem:[%s2381_s4 + $0xb8] sm:$0xff] %vm1151_vm1, %v2260_v28  ;;  %v687_v29 = vmax.f32 %v649_v48, 0.0  ;;  %v751_v2 = vadd.f32 1e-08, %v649_v48  ;;  %v684_v27 = vmax.f32 %v640_v37, 0.0  ;;  %v939_v35 = vmul.f32 %v2242_v0, %v2242_v0 }
 0x16f   :  { %v968_v55 = vadd.f32 %v967_v60, %v937_v10  ;;  %v838_v20 = vmul.f32 %v806_v7, %v2218_v18  ;;  %v748_v32 = vadd.f32 1e-08, %v640_v37  ;;  %v868_v62 = vmul.f32 %v836_v24, %v1999_v31  ;;  %v655_v18 = vpop.xlane.xlu1 %654  ;;  %v658_v48 = vpop.xlane.xlu0 %657 }
 0x170   :  { %v1677_v41 = vpop.eup %1676  ;;  %v841_v9 = vmul.f32 %v809_v23, %v2207_v52  ;;  %v2273_v16 = vmin.f32 %v687_v29, 1.0  ;;  %v2276_v61 = vmin.f32 %v684_v27, 1.0  ;;  %v807_v8 = vmul.f32 9.0, %v2220_v12 }
 0x171   :  { %v870_v45 = vmul.f32 %v1997_v30, %v838_v20  ;;  %1684 = vrcp.f32 %v748_v32  ;;  %v899_v17 = vadd.f32 %v898_v25, %v868_v62  ;;  %v938_v42 = vmul.f32 %v868_v62, %v868_v62 }
 0x172   :  { %v1679_v37 = vpop.eup %1678  ;;  %v1364_v4 = vpack.c.bf16 %v868_v62, %v867_v13  ;;  %1686 = vrcp.f32 %v751_v2  ;;  %1180 = vst.msk [vmem:[%s2381_s4 + $0xe0] sm:$0xff] %vm1151_vm1, %v2273_v16  ;;  %1177 = vst.msk [vmem:[%s2381_s4 + $0xc8] sm:$0xff] %vm1151_vm1, %v2276_v61  ;;  %v839_v52 = vmul.f32 %v807_v8, %v2183_v40  ;;  %v689_v12 = vmax.f32 %v655_v18, 0.0 }
 0x173   :  { %v940_v31 = vmul.f32 %v870_v45, %v870_v45  ;;  %v1369_v30 = vpack.c.bf16 %v870_v45, %v2242_v0  ;;  %v900_v3 = vadd.f32 %v899_v17, %v2242_v0  ;;  %v969_v58 = vadd.f32 %v968_v55, %v938_v42 }
 0x174   :  { %1408 = vst [vmem:[#allocation7 + $0x40] sm:$0xff] %v1364_v4   ;;  %v753_v1 = vadd.f32 1e-08, %v655_v18  ;;  %v686_v5 = vmax.f32 %v646_v50, 0.0  ;;  %v871_v21 = vmul.f32 %v839_v52, %v2009_v36  ;;  %v2293_v56 = vmin.f32 %v689_v12, 1.0 }
 0x175   :  { %1409 = vst [vmem:[#allocation7 + $0x48] sm:$0xff] %v1369_v30   ;;  %v750_v13 = vadd.f32 1e-08, %v646_v50  ;;  %v808_v26 = vmul.f32 9.0, %v1679_v37  ;;  %v1681_v57 = vpop.eup %1680  ;;  %v970_v6 = vadd.f32 %v969_v58, %v939_v35  ;;  %v901_v44 = vadd.f32 %v900_v3, %v870_v45 }
 0x176   :  { %1688 = vrcp.f32 %v753_v1  ;;  %v718_v33 = vmin.f32 %v686_v5, 1.0  ;;  %v873_v46 = vmul.f32 %v2005_v34, %v841_v9  ;;  %v941_v0 = vmul.f32 %v871_v21, %v871_v21  ;;  %1182 = vst.msk [vmem:[%s2381_s4 + $0xf0] sm:$0xff] %vm1151_vm1, %v2293_v56 }
 0x177   :  { %v1683_v40 = vpop.eup %1682  ;;  %1690 = vrcp.f32 %v750_v13  ;;  %v840_v36 = vmul.f32 %v808_v26, %v2238_v53  ;;  %v902_v50 = vadd.f32 %v901_v44, %v871_v21  ;;  %v971_v15 = vadd.f32 %v970_v6, %v940_v31 }
 0x178   :  { %1179 = vst.msk [vmem:[%s2381_s4 + $0xd8] sm:$0xff] %vm1151_vm1, %v718_v33  ;;  %v810_v10 = vmul.f32 9.0, %v1683_v40  ;;  %v688_v34 = vmax.f32 %v652_v49, 0.0  ;;  %v813_v25 = vmul.f32 9.0, %v1681_v57  ;;  %v752_v60 = vadd.f32 1e-08, %v652_v49 }
 0x179   :  { %v872_v23 = vmul.f32 %v840_v36, %v2015_v39  ;;  %v811_v7 = vmul.f32 9.0, %v1677_v41  ;;  %v972_v24 = vadd.f32 %v971_v15, %v941_v0  ;;  %v690_v53 = vmax.f32 %v658_v48, 0.0 }
 0x17a   :  { %v842_v29 = vmul.f32 %v810_v10, %v2260_v28  ;;  %v720_v2 = vmin.f32 %v688_v34, 1.0  ;;  %v943_v20 = vmul.f32 %v873_v46, %v873_v46  ;;  %1692 = vrcp.f32 %v752_v60 }
 0x17b   :  { %v1685_v55 = vpop.eup %1684  ;;  %v903_v27 = vadd.f32 %v902_v50, %v872_v23  ;;  %v942_v32 = vmul.f32 %v872_v23, %v872_v23  ;;  %v1374_v35 = vpack.c.bf16 %v872_v23, %v871_v21  ;;  %v843_v39 = vmul.f32 %v811_v7, %v2229_v19 }
 0x17c   :  { %v1687_v62 = vpop.eup %1686  ;;  %v874_v9 = vmul.f32 %v2013_v38, %v842_v29  ;;  %1181 = vst.msk [vmem:[%s2381_s4 + $0xe8] sm:$0xff] %vm1151_vm1, %v720_v2  ;;  %v722_v41 = vmin.f32 %v690_v53, 1.0  ;;  %v845_v8 = vmul.f32 %v813_v25, %v2251_v54  ;;  %v754_v18 = vadd.f32 1e-08, %v658_v48 }
 0x17d   :  { %v904_v28 = vadd.f32 %v903_v27, %v873_v46  ;;  %v973_v45 = vadd.f32 %v972_v24, %v942_v32  ;;  %1410 = vst [vmem:[#allocation7 + $0x50] sm:$0xff] %v1374_v35   ;;  %v875_v17 = vmul.f32 %v843_v39, %v2023_v51  ;;  %v812_v38 = vmul.f32 9.0, %v1685_v55 }
 0x17e   :  { %v944_v49 = vmul.f32 %v874_v9, %v874_v9  ;;  %v1379_v37 = vpack.c.bf16 %v874_v9, %v873_v46  ;;  %1183 = vst.msk [vmem:[%s2381_s4 + $0xf8] sm:$0xff] %vm1151_vm1, %v722_v41  ;;  %1694 = vrcp.f32 %v754_v18  ;;  %v815_v19 = vmul.f32 9.0, %v1687_v62  ;;  %s1819_s4 = smov [#allocation7]  }
 0x17f   :  { %v974_v42 = vadd.f32 %v973_v45, %v943_v20  ;;  %v905_v4 = vadd.f32 %v904_v28, %v874_v9  ;;  %v844_v30 = vmul.f32 %v812_v38, %v2276_v61  ;;  %v877_v52 = vmul.f32 %v2019_v47, %v845_v8  ;;  %s1189_s12 = sshll.u32 %s1819_s4, 4  ;;  %s1190_s12 = int_to_ptr.vmem [resolvable:$true] %s1189_s12 }
 0x180   :  { %v1689_v31 = vpop.eup %1688  ;;  %1411 = vst [vmem:[#allocation7 + $0x58] sm:$0xff] %v1379_v37   ;;  %v945_v3 = vmul.f32 %v875_v17, %v875_v17  ;;  %v847_v5 = vmul.f32 %v815_v19, %v2273_v16  ;;  %s1740_s13 = scalar_lea.vmem %s1190_s12, 2048  ;;  %p1745_p3 = scmp.lt.s32.totalorder %s1190_s12, %s1190_s12 }
 0x181   :  { %v1691_v54 = vpop.eup %1690  ;;  %v906_v12 = vadd.f32 %v905_v4, %v875_v17  ;;  %v975_v51 = vadd.f32 %v974_v42, %v944_v49  ;;  %v876_v1 = vmul.f32 %v844_v30, %v2043_v63  ;;  %v817_v21 = vmul.f32 9.0, %v1689_v31  ;;  %p1741_p2 = scmp.ne.s32.totalorder %s1190_s12, %s1740_s13  ;;  %p1746_p4 = scmp.lt.s32.totalorder %s1740_s13, %s1740_s13 }
 0x182   :  { %v814_v58 = vmul.f32 9.0, %v1691_v54  ;;  %v947_v40 = vmul.f32 %v877_v52, %v877_v52  ;;  %v879_v36 = vmul.f32 %v847_v5, %v2065_v14 }
 0x183   :  { %v976_v13 = vadd.f32 %v975_v51, %v945_v3  ;;  %v907_v57 = vadd.f32 %v906_v12, %v876_v1  ;;  %v946_v6 = vmul.f32 %v876_v1, %v876_v1  ;;  %v1384_v44 = vpack.c.bf16 %v876_v1, %v875_v17  ;;  %p1747_p5 = por %p1746_p4, %p1745_p3 }
 0x184   :  { %v846_v26 = vmul.f32 %v814_v58, %v718_v33  ;;  %v1693_v46 = vpop.eup %1692  ;;  %v849_v48 = vmul.f32 %v817_v21, %v2293_v56  ;;  %v949_v60 = vmul.f32 %v879_v36, %v879_v36 }
 0x185   :  { %v908_v0 = vadd.f32 %v907_v57, %v877_v52  ;;  %v977_v47 = vadd.f32 %v976_v13, %v946_v6  ;;  %1412 = vst [vmem:[#allocation7 + $0x60] sm:$0xff] %v1384_v44   ;;  %v816_v63 = vmul.f32 9.0, %v1693_v46  ;;  %p1748_p6 = pnand %p1747_p5, %p1741_p2 }
 0x186   :  { %v878_v61 = vmul.f32 %v2035_v59, %v846_v26  ;;  %v881_v59 = vmul.f32 %v2057_v11, %v849_v48 }
 0x187   :  { %v978_v15 = vadd.f32 %v977_v47, %v947_v40  ;;  %v848_v34 = vmul.f32 %v816_v63, %v720_v2 }
 0x188   :  { %v948_v50 = vmul.f32 %v878_v61, %v878_v61  ;;  %v1389_v16 = vpack.c.bf16 %v878_v61, %v877_v52  ;;  %v909_v10 = vadd.f32 %v908_v0, %v878_v61  ;;  %v1695_v33 = vpop.eup %1694  ;;  %v951_v27 = vmul.f32 %v881_v59, %v881_v59 }
 0x189   :  { %v818_v23 = vmul.f32 9.0, %v1695_v33  ;;  %v880_v24 = vmul.f32 %v848_v34, %v2087_v43 }
 0x18a   :  { %1413 = vst [vmem:[#allocation7 + $0x68] sm:$0xff] %v1389_v16   ;;  %v910_v25 = vadd.f32 %v909_v10, %v879_v36  ;;  %v979_v7 = vadd.f32 %v978_v15, %v948_v50 }
 0x18b   :  { %v850_v14 = vmul.f32 %v818_v23, %v722_v41  ;;  %v950_v56 = vmul.f32 %v880_v24, %v880_v24  ;;  %v1394_v55 = vpack.c.bf16 %v880_v24, %v879_v36 }
 0x18c   :  { %v980_v29 = vadd.f32 %v979_v7, %v949_v60  ;;  %v911_v53 = vadd.f32 %v910_v25, %v880_v24 }
 0x18d   :  { %v882_v20 = vmul.f32 %v2079_v22, %v850_v14  ;;  %1414 = vst [vmem:[#allocation7 + $0x70] sm:$0xff] %v1394_v55  }
 0x18e   :  { %v912_v2 = vadd.f32 %v911_v53, %v881_v59  ;;  %v981_v32 = vadd.f32 %v980_v29, %v950_v56 }
 0x18f   :  { %v952_v35 = vmul.f32 %v882_v20, %v882_v20  ;;  %v1399_v62 = vpack.c.bf16 %v882_v20, %v881_v59 }
 0x190   :  { %v913_v9 = vadd.f32 %v912_v2, %v882_v20  ;;  %v982_v11 = vadd.f32 %v981_v32, %v951_v27 }
 0x191   :  { %1415 = vst [vmem:[#allocation7 + $0x78] sm:$0xff] %v1399_v62  }
 0x192   :  { %v983_v43 = vadd.f32 %v982_v11, %v952_v35  ;;  %v914_v39 = vrot.slane %v913_v9, 4 }
 0x193   :  { %1751 = shalt.err (!%p1748_p6)
}
 0x194   :  { %s1752_s16 = scalar_lea.hbm %s2380_s3, 2048 }
 0x195   :  { %p1753_p7 = scmp.ne.s32.totalorder %s2380_s3, %s1752_s16  ;;  %p1756_p8 = scmp.lt.u32.totalorder %s1752_s16, %s2380_s3 }
 0x197   :  { %p1758_p9 = pnand %p1756_p8, %p1753_p7 }
 0x199   :  { %1761 = shalt.err (!%p1758_p9)
}
 0x19a   :  { %1195 = dma.vmem_to_hbm [thread:$0]  %s1190_s12, 2048, %s2380_s3, [#allocation4], %s1815_s30, %s1815_s30, %s1816_s7   ;;  %v915_v22 = vadd.f32 %v914_v39, %v913_v9  ;;  %v984_v41 = vrot.slane %v983_v43, 4 }
 0x19b   :  { %s1820_s21 = smov [#allocation8]   ;;  %s1821_s2 = smov [#allocation10]  }
 0x19c   :  { %v916_v28 = vrot.slane %v915_v22, 2  ;;  %v985_v45 = vadd.f32 %v984_v41, %v983_v43  ;;  %s1204_s22 = sshll.u32 %s1820_s21, 4  ;;  %s1214_s23 = sshll.u32 %s1821_s2, 4  ;;  %s1205_s22 = int_to_ptr.vmem [resolvable:$true] %s1204_s22  ;;  %s2345_s23 = int_to_ptr.vmem [resolvable:$true] %s1214_s23 }
 0x19d   :  { %s1762_s3 = scalar_lea.vmem %s1205_s22, 16  ;;  %s1766_s30 = scalar_lea.vmem %s1205_s22, 32 }
 0x19e   :  { %v917_v8 = vadd.f32 %v916_v28, %v915_v22  ;;  %v986_v18 = vrot.slane %v985_v45, 2  ;;  %p1763_p10 = scmp.ne.s32.totalorder %s1205_s22, %s1762_s3  ;;  %p1767_p11 = scmp.lt.s32.totalorder %s1205_s22, %s1205_s22 }
 0x19f   :  { %p1768_p12 = scmp.lt.s32.totalorder %s1766_s30, %s1762_s3 }
 0x1a0   :  { %v918_v49 = vrot.slane %v917_v8, 1  ;;  %v987_v37 = vadd.f32 %v986_v18, %v985_v45 }
 0x1a1   :  { %p1769_p13 = por %p1768_p12, %p1767_p11 }
 0x1a2   :  { %v919_v17 = vadd.f32 %v918_v49, %v917_v8  ;;  %v988_v38 = vrot.slane %v987_v37, 1 }
 0x1a3   :  { %p1770_p0 = pnand %p1769_p13, %p1763_p10 }
 0x1a4   :  { %920 = vst [vmem:[#allocation8] sm:$0x1] %v919_v17  ;;  %v989_v42 = vadd.f32 %v988_v38, %v987_v37 }
 0x1a5   :  { %1773 = shalt.err (!%p1770_p0)
}
 0x1a6   :  { %s1774_s25 = scalar_lea.hbm %s2382_s5, 16 }
 0x1a7   :  { %p1775_p1 = scmp.ne.s32.totalorder %s2382_s5, %s1774_s25  ;;  %p1778_p2 = scmp.lt.u32.totalorder %s1774_s25, %s2382_s5 }
 0x1a9   :  { %p1780_p3 = pnand %p1778_p2, %p1775_p1 }
 0x1ab   :  { %1783 = shalt.err (!%p1780_p3)
}
 0x1ac   :  { %1207 = dma.vmem_to_hbm [thread:$0]  %s1205_s22, 16, %s2382_s5, [#allocation9]   ;;  %990 = vst [vmem:[#allocation10] sm:$0x1] %v989_v42 }
 0x1ad   :  { %s1784_s10 = scalar_lea.vmem %s2345_s23, 16  ;;  %s1788_s11 = scalar_lea.vmem %s2345_s23, 32 }
 0x1ae   :  { %p1785_p4 = scmp.ne.s32.totalorder %s2345_s23, %s1784_s10  ;;  %p1789_p5 = scmp.lt.s32.totalorder %s2345_s23, %s2345_s23 }
 0x1af   :  { %p1790_p6 = scmp.lt.s32.totalorder %s1788_s11, %s1784_s10 }
 0x1b1   :  { %p1791_p7 = por %p1790_p6, %p1789_p5 }
 0x1b3   :  { %p1792_p8 = pnand %p1791_p7, %p1785_p4 }
 0x1b5   :  { %1795 = shalt.err (!%p1792_p8)
}
 0x1b6   :  { %s1796_s13 = scalar_lea.hbm %s2383_s6, 16 }
 0x1b7   :  { %p1797_p9 = scmp.ne.s32.totalorder %s2383_s6, %s1796_s13  ;;  %p1800_p10 = scmp.lt.u32.totalorder %s1796_s13, %s2383_s6 }
 0x1b9   :  { %p1802_p11 = pnand %p1800_p10, %p1797_p9 }
 0x1bb   :  { %1805 = shalt.err (!%p1802_p11)
}
 0x1bc   :  { %1217 = dma.vmem_to_hbm [thread:$0]  %s2345_s23, 16, %s2383_s6, [#allocation9]  }
 0x1bd   :  { %1810 = dma.done.wait [#allocation4], 2048  }
 0x1be   :  { %1811 = vsyncadd [#allocation4], 4294965248 }
 0x1bf   :  { %1812 = dma.done.wait [#allocation9], 32  }
 0x1c0   :  { %1813 = vsyncadd [#allocation9], 4294967264 }
 0x1c1   :  { %1229 = vsyncpa [#allocation3], 1 }
 0x1c2   :  { %1230 = vsyncpa [#allocation6], 1 }
 0x1c3   :  { %1231 = vsyncpa [#allocation4], 1 }
 0x1c4   :  { %1232 = vsyncpa [#allocation9], 1 }

</bundles_post_ra>
